<compile_context>
chip_gen: v5e
topology: v5e:2x2
jax: 0.10.0
libtpu: 0.0.40
codegen_flags: <defaults>
</compile_context>

<pallas_src>
import jax
import jax.numpy as jnp
from jax import lax
from jax.experimental import pallas as pl
from jax.experimental.pallas import tpu as pltpu


_TARGET_BLOCK_BYTES = 4 * 1024 * 1024   # streaming tile target for the fallback path
_MAX_POOL_CHUNKS = 64                   # unroll cap for the stage-1 lane-chunk loop


def _round_up(v, m):
    return ((v + m - 1) // m) * m


def _vmem_physical_bytes():
    """Physical VMEM of the attached TPU (64 MiB v7x, 128 MiB v5e/v6e)."""
    try:
        cap = getattr(pltpu.get_tpu_info(), "vmem_capacity_bytes", None)
        if cap:
            return int(cap)
    except Exception:
        pass
    return 64 * 1024 * 1024             # conservative default (v7x)


def _excite_mlp(pooled_col, w1_ref, w2_ref, Cr):
    """Squeeze/excite MLP on the VPU, keeping channels on sublanes throughout.

    pooled_col: (C, 1) f32 channel means (C on sublanes).
    w1_ref:     (C, Cr) == W1.T ;  w2_ref: (C, Cr) == W2.
    Returns sigmoid scale of shape (C, 1).  FLOPs ~ 2*C*Cr, negligible, and no
    lane<->sublane relayout or degenerate M=1 matmul is needed.
    """
    # h[j] = relu(sum_c W1[j, c] * pooled[c])        -> (1, Cr)
    h = jnp.maximum(
        jnp.sum(w1_ref[...] * pooled_col, axis=0, keepdims=True), 0.0)
    # logits[c] = sum_j W2[c, j] * h[j]              -> (C, 1)
    logits = jnp.sum(w2_ref[...] * h, axis=-1, keepdims=True)
    return jax.nn.sigmoid(logits)


# --------------------------------------------------------------------------- #
# Strategy A: fused single pass (per-batch slab resident in VMEM)
# --------------------------------------------------------------------------- #
def _se_fused(x3, w1t, w2t, B, C, HW, Cr, inv_hw, mul_in_f32, vmem_limit, itemsize):
    def kernel(x_ref, w1_ref, w2_ref, o_ref):
        xb = x_ref[...]                                              # (1, C, HW)
        # Squeeze: global average pool. VPU adds across lane-vregs + one
        # cross-lane reduce per batch; keepdims keeps C on sublanes.
        pooled_col = (jnp.sum(xb.astype(jnp.float32), axis=-1, keepdims=True)[0]
                      * inv_hw)                                      # (C, 1)
        s = _excite_mlp(pooled_col, w1_ref, w2_ref, Cr)[None]        # (1, C, 1)
        # Scale: per-channel rescale of the resident slab (lane broadcast).
        if mul_in_f32:
            o_ref[...] = (xb.astype(jnp.float32) * s).astype(o_ref.dtype)
        else:   # bf16 path (v6e/v7x): halves VALU/vreg work per streamed byte
            o_ref[...] = (xb * s.astype(xb.dtype)).astype(o_ref.dtype)

    cost = pl.CostEstimate(
        flops=3 * B * C * HW + 4 * B * C * Cr,
        transcendentals=B * C,
        bytes_accessed=2 * B * C * HW * itemsize + 2 * C * Cr * 4,
    )

    # TODO(synk): for HW < 128 feature maps (e.g. 7x7) pack several channels per
    # lane row so DMAs/stores stay lane-dense instead of masked 49-wide rows.
    # TODO(synk): for B == 1 on v7x, split HW across the two TensorCores so the
    # second core does not idle during this HBM-bound pass.
    return pl.pallas_call(
        kernel,
        out_shape=jax.ShapeDtypeStruct((B, C, HW), x3.dtype),
        grid_spec=pltpu.PrefetchScalarGridSpec(
            num_scalar_prefetch=0,
            grid=(B,),
            in_specs=[
                pl.BlockSpec((1, C, HW), lambda b: (b, 0, 0)),
                pl.BlockSpec((C, Cr), lambda b: (0, 0)),   # resident weights
                pl.BlockSpec((C, Cr), lambda b: (0, 0)),
            ],
            out_specs=pl.BlockSpec((1, C, HW), lambda b: (b, 0, 0)),
        ),
        compiler_params=pltpu.CompilerParams(
            dimension_semantics=("parallel",),
            vmem_limit_bytes=vmem_limit,
        ),
        cost_estimate=cost,
    )(x3, w1t, w2t)


# --------------------------------------------------------------------------- #
# Strategy B: two-pass fallback for slabs that do not fit VMEM
# --------------------------------------------------------------------------- #
def _pick_pool_hw_block(c, hw, itemsize):
    """Lane chunk for the pooling pass; always a multiple of 128."""
    hw_pad = _round_up(hw, 128)
    blk = (_TARGET_BLOCK_BYTES // (max(c, 8) * itemsize)) // 128 * 128
    return max(128, min(blk, _MAX_POOL_CHUNKS * 128, hw_pad))


def _pick_scale_blocks(c, hw, itemsize):
    """(c_blk, hw_blk) for the elementwise scale pass; block is (1, c_blk, hw_blk)."""
    target = _TARGET_BLOCK_BYTES
    if hw * 8 * itemsize <= target:
        hw_blk = hw
    else:
        hw_blk = max(128, (target // (8 * itemsize)) // 128 * 128)
        if hw_blk >= hw:
            hw_blk = hw
    rows = max(1, target // (hw_blk * itemsize))
    if rows >= c or c <= 8:
        c_blk = c
    else:
        c_blk = max(8, (rows // 8) * 8)
    return c_blk, hw_blk


def _se_two_pass(x3, w1t, w2t, B, C, HW, Cr, inv_hw, mul_in_f32, vmem_limit, itemsize):
    # ---------- stage 1: global average pool + excite MLP -> (B, C, 1) ----------
    hw_blk = _pick_pool_hw_block(C, HW, itemsize)
    n_hw = pl.cdiv(HW, hw_blk)
    n_chunks = hw_blk // 128
    needs_mask = (HW % hw_blk) != 0

    def pool_excite_kernel(x_ref, w1_ref, w2_ref, s_ref, acc_ref):
        k = pl.program_id(1)

        @pl.when(k == 0)
        def _init():
            acc_ref[...] = jnp.zeros_like(acc_ref)

        # Hot loop: accumulate 128-lane chunks into a per-lane partial
        # accumulator.  Pure VPU adds; no per-step cross-lane reduce/relayout.
        part = acc_ref[...]                                          # (1, C, 128)
        for j in range(n_chunks):                                    # static unroll (<= 64)
            xc = x_ref[:, :, j * 128:(j + 1) * 128].astype(jnp.float32)
            if needs_mask:                                           # static branch
                pos = (k * hw_blk + j * 128
                       + lax.broadcasted_iota(jnp.int32, (1, 1, 128), 2))
                xc = jnp.where(pos < HW, xc, 0.0)
            part = part + xc
        acc_ref[...] = part

        @pl.when(k == pl.num_programs(1) - 1)
        def _finalize():
            # Single cross-lane reduce per batch, then the tiny MLP on the VPU;
            # scale is produced directly in (1, C, 1) layout (C on sublanes).
            pooled_col = (jnp.sum(acc_ref[...], axis=-1, keepdims=True)[0]
                          * inv_hw)                                  # (C, 1)
            s_ref[...] = _excite_mlp(pooled_col, w1_ref, w2_ref, Cr)[None]

    pool_cost = pl.CostEstimate(
        flops=2 * B * C * HW + 4 * B * C * Cr,
        transcendentals=B * C,
        bytes_accessed=B * C * HW * itemsize + 2 * C * Cr * 4 + B * C * 4,
    )

    # TODO(synk): single-buffer the grid-invariant weight blocks once
    # pipeline_mode=pl.Buffered(1) is reliably supported (saves VMEM at huge C).
    scale = pl.pallas_call(
        pool_excite_kernel,
        out_shape=jax.ShapeDtypeStruct((B, C, 1), jnp.float32),
        grid_spec=pltpu.PrefetchScalarGridSpec(
            num_scalar_prefetch=0,
            grid=(B, n_hw),
            in_specs=[
                pl.BlockSpec((1, C, hw_blk), lambda b, k: (b, 0, k)),
                pl.BlockSpec((C, Cr), lambda b, k: (0, 0)),
                pl.BlockSpec((C, Cr), lambda b, k: (0, 0)),
            ],
            out_specs=pl.BlockSpec((1, C, 1), lambda b, k: (b, 0, 0)),
            scratch_shapes=[pltpu.VMEM((1, C, 128), jnp.float32)],
        ),
        compiler_params=pltpu.CompilerParams(
            dimension_semantics=("parallel", "arbitrary"),
            vmem_limit_bytes=vmem_limit,
        ),
        cost_estimate=pool_cost,
    )(x3, w1t, w2t)

    # ---------- stage 2: out = x * scale (lane-dense ~4 MiB tiles) ----------
    c_blk, hw_blk2 = _pick_scale_blocks(C, HW, itemsize)

    def scale_kernel(x_ref, s_ref, o_ref):
        xb = x_ref[...]
        # NOTE: partial tail tiles multiply padded garbage; those regions are
        # clipped on writeback so the visible result is exact.
        if mul_in_f32:
            o_ref[...] = (xb.astype(jnp.float32) * s_ref[...]).astype(o_ref.dtype)
        else:
            o_ref[...] = (xb * s_ref[...].astype(xb.dtype)).astype(o_ref.dtype)

    scale_cost = pl.CostEstimate(
        flops=B * C * HW,
        transcendentals=0,
        bytes_accessed=2 * B * C * HW * itemsize + B * C * 4,
    )

    return pl.pallas_call(
        scale_kernel,
        out_shape=jax.ShapeDtypeStruct((B, C, HW), x3.dtype),
        grid_spec=pltpu.PrefetchScalarGridSpec(
            num_scalar_prefetch=0,
            grid=(B, pl.cdiv(C, c_blk), pl.cdiv(HW, hw_blk2)),
            in_specs=[
                pl.BlockSpec((1, c_blk, hw_blk2), lambda b, ci, hi: (b, ci, hi)),
                pl.BlockSpec((1, c_blk, 1), lambda b, ci, hi: (b, ci, 0)),
            ],
            out_specs=pl.BlockSpec((1, c_blk, hw_blk2), lambda b, ci, hi: (b, ci, hi)),
        ),
        compiler_params=pltpu.CompilerParams(
            dimension_semantics=("parallel", "parallel", "parallel"),
            vmem_limit_bytes=vmem_limit,
        ),
        cost_estimate=scale_cost,
    )(x3, scale)


# --------------------------------------------------------------------------- #
# Public wrapper
# --------------------------------------------------------------------------- #
def se_layer(x, w1, w2):
    """SELayer forward. x: (B, C, H, W); w1: (C//r, C); w2: (C, C//r)."""
    B, C, H, W = x.shape
    HW = H * W
    Cr = w1.shape[0]
    assert w1.shape == (Cr, C) and w2.shape == (C, Cr)

    itemsize = x.dtype.itemsize
    inv_hw = 1.0 / float(HW)

    # Generation-aware VMEM budget: 48 MiB limit on v7x (64 MiB physical),
    # 96 MiB on v5e/v6e (128 MiB physical; also overrides v5e's 16 MiB default).
    vmem_cap = _vmem_physical_bytes()
    vmem_limit = min(int(vmem_cap * 3 // 4), 96 * 1024 * 1024)

    # Weights in a single (C, Cr) orientation (channels on sublanes); f32.
    w1t = w1.T.astype(jnp.float32)          # (C, Cr) == W1.T
    w2t = w2.astype(jnp.float32)            # (C, Cr) == W2
    weight_bytes = 2 * 2 * C * Cr * 4       # both weights, double-buffered

    x3 = x.reshape(B, C, HW)                # free reshape; H*W stays on lanes
    mul_in_f32 = (x.dtype == jnp.float32)   # keep bf16 multiplies in bf16 (v6e/v7x)

    # Fused-path VMEM need: x in x2 + out x2 (double buffered, with lane/sublane
    # padding) + in-kernel f32 temporaries + weights + margin.
    pad_c, pad_hw = _round_up(C, 8), _round_up(HW, 128)
    slab_in = pad_c * pad_hw * itemsize
    slab_f32 = pad_c * pad_hw * 4
    fused_need = 4 * slab_in + 2 * slab_f32 + weight_bytes + (2 << 20)

    if fused_need <= vmem_limit:
        out3 = _se_fused(x3, w1t, w2t, B, C, HW, Cr, inv_hw, mul_in_f32,
                         vmem_limit, itemsize)
    else:
        out3 = _se_two_pass(x3, w1t, w2t, B, C, HW, Cr, inv_hw, mul_in_f32,
                            vmem_limit, itemsize)
    return out3.reshape(B, C, H, W)


def se_layer_ref(x, w1, w2):
    """Pure-JAX reference matching the PyTorch SELayer forward."""
    xf = x.astype(jnp.float32)
    y = jnp.mean(xf, axis=(2, 3))                              # (B, C)
    h = jnp.maximum(y @ w1.astype(jnp.float32).T, 0.0)         # (B, Cr)
    s = jax.nn.sigmoid(h @ w2.astype(jnp.float32).T)           # (B, C)
    return (xf * s[:, :, None, None]).astype(x.dtype)


if __name__ == "__main__":
    key = jax.random.PRNGKey(0)
    k_x, k_w1, k_w2 = jax.random.split(key, 3)

    B, C, H, W = 2, 64, 16, 16
    reduction = 16
    Cr = C // reduction   # 4

    x = jax.random.normal(k_x, (B, C, H, W), dtype=jnp.float32)
    w1 = jax.random.normal(k_w1, (Cr, C), dtype=jnp.float32) * (1.0 / (C ** 0.5))
    w2 = jax.random.normal(k_w2, (C, Cr), dtype=jnp.float32) * (1.0 / (Cr ** 0.5))

    out = jax.jit(se_layer)(x, w1, w2)
    out = jax.block_until_ready(out)

    ref = se_layer_ref(x, w1, w2)
    assert out.shape == x.shape and out.dtype == x.dtype
    err = float(jnp.max(jnp.abs(out - ref)))
    assert jnp.allclose(out, ref, atol=1e-4, rtol=1e-4), err

    print("KERNEL_OK")
</pallas_src>

<mosaic_0001>
module attributes {stable_mosaic.version = 11 : i64} {
  func.func @kernel(%arg0: i32, %arg1: memref<1x64x256xf32, #tpu.memory_space<vmem>>, %arg2: memref<64x4xf32, #tpu.memory_space<vmem>>, %arg3: memref<64x4xf32, #tpu.memory_space<vmem>>, %arg4: memref<1x64x256xf32, #tpu.memory_space<vmem>>) attributes {dimension_semantics = [#tpu.dimension_semantics<parallel>], iteration_bounds = array<i64: 2>, scalar_prefetch = 0 : i64, scratch_operands = 0 : i64, tpu.core_type = #tpu.core_type<tc>, window_params = [{transform_indices = @transform_0, window_bounds = array<i64: 1, 64, 256>}, {pipeline_mode = #tpu.pipeline_mode<synchronous>, transform_indices = @transform_1, window_bounds = array<i64: 64, 4>}, {pipeline_mode = #tpu.pipeline_mode<synchronous>, transform_indices = @transform_2, window_bounds = array<i64: 64, 4>}, {transform_indices = @transform_3, window_bounds = array<i64: 1, 64, 256>}]} {
    %c0 = arith.constant 0 : index
    %c0_0 = arith.constant 0 : index
    %c0_1 = arith.constant 0 : index
    %0 = vector.load %arg1[%c0, %c0_0, %c0_1] : memref<1x64x256xf32, #tpu.memory_space<vmem>>, vector<1x64x256xf32>
    %cst = arith.constant dense<0.000000e+00> : vector<1x64xf32>
    %1 = vector.multi_reduction <add>, %0, %cst [2] : vector<1x64x256xf32> to vector<1x64xf32>
    %2 = vector.shape_cast %1 : vector<1x64xf32> to vector<1x64x1xf32>
    %3 = vector.shape_cast %2 : vector<1x64x1xf32> to vector<64x1xf32>
    %cst_2 = arith.constant 3.906250e-03 : f32
    %4 = vector.broadcast %cst_2 : f32 to vector<64x1xf32>
    %5 = arith.mulf %3, %4 : vector<64x1xf32>
    %c0_3 = arith.constant 0 : index
    %c0_4 = arith.constant 0 : index
    %6 = vector.load %arg2[%c0_3, %c0_4] : memref<64x4xf32, #tpu.memory_space<vmem>>, vector<64x4xf32>
    %7 = vector.broadcast %5 : vector<64x1xf32> to vector<64x4xf32>
    %8 = arith.mulf %6, %7 : vector<64x4xf32>
    %cst_5 = arith.constant dense<0.000000e+00> : vector<4xf32>
    %9 = vector.multi_reduction <add>, %8, %cst_5 [0] : vector<64x4xf32> to vector<4xf32>
    %10 = vector.shape_cast %9 : vector<4xf32> to vector<1x4xf32>
    %cst_6 = arith.constant 0.000000e+00 : f32
    %11 = vector.broadcast %cst_6 : f32 to vector<1x4xf32>
    %12 = arith.maximumf %10, %11 : vector<1x4xf32>
    %c0_7 = arith.constant 0 : index
    %c0_8 = arith.constant 0 : index
    %13 = vector.load %arg3[%c0_7, %c0_8] : memref<64x4xf32, #tpu.memory_space<vmem>>, vector<64x4xf32>
    %14 = vector.broadcast %12 : vector<1x4xf32> to vector<64x4xf32>
    %15 = arith.mulf %13, %14 : vector<64x4xf32>
    %cst_9 = arith.constant dense<0.000000e+00> : vector<64xf32>
    %16 = vector.multi_reduction <add>, %15, %cst_9 [1] : vector<64x4xf32> to vector<64xf32>
    %17 = vector.shape_cast %16 : vector<64xf32> to vector<64x1xf32>
    %18 = arith.negf %17 : vector<64x1xf32>
    %19 = math.exp %18 : vector<64x1xf32>
    %cst_10 = arith.constant 1.000000e+00 : f32
    %20 = vector.broadcast %cst_10 : f32 to vector<64x1xf32>
    %21 = arith.addf %20, %19 : vector<64x1xf32>
    %22 = arith.divf %20, %21 : vector<64x1xf32>
    %23 = vector.shape_cast %22 : vector<64x1xf32> to vector<1x64x1xf32>
    %24 = vector.broadcast %23 : vector<1x64x1xf32> to vector<1x64x256xf32>
    %25 = arith.mulf %0, %24 : vector<1x64x256xf32>
    %c0_11 = arith.constant 0 : index
    %c0_12 = arith.constant 0 : index
    %c0_13 = arith.constant 0 : index
    %26 = vector.load %arg4[%c0_11, %c0_12, %c0_13] : memref<1x64x256xf32, #tpu.memory_space<vmem>>, vector<1x64x256xf32>
    tpu.vector_store %arg4[%c0_11, %c0_12, %c0_13], %25 {strides = array<i32>} : memref<1x64x256xf32, #tpu.memory_space<vmem>>, vector<1x64x256xf32>,
    return
  }
  func.func @transform_0(%arg0: i32) -> (i32, i32, i32) {
    %c0_i32 = arith.constant 0 : i32
    %c0_i32_0 = arith.constant 0 : i32
    %c0_i32_1 = arith.constant 0 : i32
    return %arg0, %c0_i32, %c0_i32_0 : i32, i32, i32
  }
  func.func @transform_1(%arg0: i32) -> (i32, i32) {
    %c0_i32 = arith.constant 0 : i32
    %c0_i32_0 = arith.constant 0 : i32
    %c0_i32_1 = arith.constant 0 : i32
    return %c0_i32, %c0_i32_0 : i32, i32
  }
  func.func @transform_2(%arg0: i32) -> (i32, i32) {
    %c0_i32 = arith.constant 0 : i32
    %c0_i32_0 = arith.constant 0 : i32
    %c0_i32_1 = arith.constant 0 : i32
    return %c0_i32, %c0_i32_0 : i32, i32
  }
  func.func @transform_3(%arg0: i32) -> (i32, i32, i32) {
    %c0_i32 = arith.constant 0 : i32
    %c0_i32_0 = arith.constant 0 : i32
    %c0_i32_1 = arith.constant 0 : i32
    return %arg0, %c0_i32, %c0_i32_0 : i32, i32, i32
  }
}

</mosaic_0001>

<bundles_post_ra>
// kernel: se_layer.1
= control target key start
LH: loop header
LB: loop body
LE: loop exit
PB: predicated region body
PF: predicated region fallthrough
CT: control target
= control target key end

     0   :  { %s626_s12 = smov 0   ;;  %s872_s0 = inlined_call_operand.vmem [shape: f32[2,64,256], index: 0, kind: input, shape index: {}]   ;;  %s873_s1 = inlined_call_operand.vmem [shape: f32[64,4], index: 1, kind: input, shape index: {}]   ;;  %s874_s2 = inlined_call_operand.vmem [shape: f32[64,4], index: 2, kind: input, shape index: {}]   ;;  %s875_s3 = inlined_call_operand.vmem [shape: f32[2,64,256], index: 3, kind: output, shape index: {}]  }
   0x1 LB: > { %s537_s13 = sadd.s32 4294967295, %s604_s12   ;;  %p541_p0 = scmp.ge.s32.totalorder %s604_s12, 1  ;;  %s604_s12 = sphi %s626_s12, %s13_s12  }
   0x2   : > { %p137_p1 = scmp.lt.s32.totalorder %s604_s12, 3 }
   0x4   : > { %p138_p2 = pnand %p541_p0, %p137_p1 }
   0x5   : > { %p161_p3 = scmp.lt.s32.totalorder (!%p138_p2), %s537_s13, 1 }
   0x6   : > { %141 = sbr.rel (%p138_p2) target bundleno = 347 (0x15b), region = 32 }
   0xb   : > { %s885_s13 = smov (!%p161_p3, %s537_s13), 1  ;;  %v219_v28 = vld [vmem:[%s873_s1] sm:$0xff]  ;;  %v221_v30 = vld [vmem:[%s873_s1 + $0x10] sm:$0xff]  ;;  %v220_v31 = vld [vmem:[%s873_s1 + $0x8] sm:$0xff]  ;;  %vm235_vm0 = vcmask 31744  }
   0xc   : > { %s556_s14 = sshll.u32 %s885_s13, 7  ;;  %v222_v35 = vld [vmem:[%s873_s1 + $0x18] sm:$0xff]  ;;  %v223_v43 = vld [vmem:[%s873_s1 + $0x20] sm:$0xff]  ;;  %v224_v45 = vld [vmem:[%s873_s1 + $0x28] sm:$0xff] }
   0xd   : > { %s165_s17 = scalar_lea.vmem %s872_s0, %s556_s14  ;;  %v225_v54 = vld [vmem:[%s873_s1 + $0x30] sm:$0xff]  ;;  %v226_v57 = vld [vmem:[%s873_s1 + $0x38] sm:$0xff]  ;;  %s792_s28 = scalar_lea.vmem %s875_s3, %s556_s14 }
   0xe   : > { %v642_v0 = vld [vmem:[%s165_s17] sm:$0xff]  ;;  %v644_v1 = vld [vmem:[%s165_s17 + $0x8] sm:$0xff]  ;;  %v660_v9 = vld [vmem:[%s165_s17 + $0x10] sm:$0xff] }
   0xf   : > { %v646_v2 = vld [vmem:[%s165_s17 + $0x20] sm:$0xff]  ;;  %v187_v3 = vadd.f32 %v644_v1, %v642_v0  ;;  %v650_v4 = vld [vmem:[%s165_s17 + $0x28] sm:$0xff]  ;;  %v662_v10 = vld [vmem:[%s165_s17 + $0x18] sm:$0xff] }
  0x10   : > { %v652_v5 = vld [vmem:[%s165_s17 + $0x40] sm:$0xff]  ;;  %v654_v6 = vld [vmem:[%s165_s17 + $0x48] sm:$0xff]  ;;  %v193_v7 = vadd.f32 %v650_v4, %v646_v2  ;;  %v664_v11 = vld [vmem:[%s165_s17 + $0x30] sm:$0xff]  ;;  %v190_v15 = vadd.f32 %v662_v10, %v660_v9 }
  0x11   : > { %v199_v8 = vadd.f32 %v654_v6, %v652_v5  ;;  %188 = vadd.xlane.f32.xlu0 %v187_v3  ;;  %v666_v12 = vld [vmem:[%s165_s17 + $0x38] sm:$0xff]  ;;  %v668_v13 = vld [vmem:[%s165_s17 + $0x50] sm:$0xff]  ;;  %v678_v18 = vld [vmem:[%s165_s17 + $0x60] sm:$0xff] }
  0x12   : > { %194 = vadd.xlane.f32.xlu1 %v193_v7  ;;  %v670_v14 = vld [vmem:[%s165_s17 + $0x58] sm:$0xff]  ;;  %v196_v16 = vadd.f32 %v666_v12, %v664_v11  ;;  %v680_v19 = vld [vmem:[%s165_s17 + $0x68] sm:$0xff]  ;;  %v682_v20 = vld [vmem:[%s165_s17 + $0x70] sm:$0xff] }
  0x13   : > { %200 = vadd.xlane.f32.xlu2 %v199_v8  ;;  %v202_v17 = vadd.f32 %v670_v14, %v668_v13  ;;  %v684_v21 = vld [vmem:[%s165_s17 + $0x78] sm:$0xff]  ;;  %v205_v22 = vadd.f32 %v680_v19, %v678_v18 }
  0x14   : > { %v208_v23 = vadd.f32 %v684_v21, %v682_v20 }
  0x19   : > { %191 = vadd.xlane.f32.xlu0 %v190_v15 }
  0x1a   : > { %197 = vadd.xlane.f32.xlu1 %v196_v16 }
  0x1b   : > { %203 = vadd.xlane.f32.xlu2 %v202_v17 }
  0x21   : > { %206 = vadd.xlane.f32.xlu0 %v205_v22 }
  0x22   : > { %209 = vadd.xlane.f32.xlu1 %v208_v23 }
  0x84   : > { %v189_v24 = vpop.xlane.xlu0 %188 }
  0x85   : > { %v195_v25 = vpop.xlane.xlu1 %194  ;;  %v211_v27 = vmul.f32 0.00390625, %v189_v24 }
  0x86   : > { %v201_v26 = vpop.xlane.xlu2 %200  ;;  %v213_v29 = vmul.f32 0.00390625, %v195_v25 }
  0x87   : > { %v227_v33 = vmul.f32 %v219_v28, %v211_v27  ;;  %v215_v40 = vmul.f32 0.00390625, %v201_v26 }
  0x88   : > { %v229_v39 = vmul.f32 %v221_v30, %v213_v29  ;;  %v260_v29 = vld [vmem:[%s874_s2 + $0x10] sm:$0xff]  ;;  %v259_v30 = vld [vmem:[%s874_s2 + $0x8] sm:$0xff] }
  0x89   : > { %v236_v46 = vsel %vm235_vm0, %v227_v33, 0.0  ;;  %v231_v50 = vmul.f32 %v223_v43, %v215_v40  ;;  %v262_v40 = vld [vmem:[%s874_s2 + $0x20] sm:$0xff] }
  0x8a   : > { %v239_v49 = vsel %vm235_vm0, %v229_v39, 0.0  ;;  %v263_v39 = vld [vmem:[%s874_s2 + $0x28] sm:$0xff] }
  0x8b   : > { %v243_v61 = vsel %vm235_vm0, %v231_v50, 0.0 }
  0x8c   : > { %v192_v32 = vpop.xlane.xlu0 %191 }
  0x8d   : > { %v212_v34 = vmul.f32 0.00390625, %v192_v32  ;;  %v198_v36 = vpop.xlane.xlu1 %197 }
  0x8e   : > { %v204_v37 = vpop.xlane.xlu2 %203  ;;  %v214_v38 = vmul.f32 0.00390625, %v198_v36 }
  0x8f   : > { %v228_v41 = vmul.f32 %v220_v31, %v212_v34  ;;  %v216_v42 = vmul.f32 0.00390625, %v204_v37  ;;  %v258_v31 = vld [vmem:[%s874_s2] sm:$0xff] }
  0x90   : > { %v230_v44 = vmul.f32 %v222_v35, %v214_v38 }
  0x91   : > { %v237_v47 = vsel %vm235_vm0, %v228_v41, 0.0  ;;  %v232_v52 = vmul.f32 %v224_v45, %v216_v42  ;;  %v261_v41 = vld [vmem:[%s874_s2 + $0x18] sm:$0xff] }
  0x92   : > { %v238_v48 = vadd.f32 %v237_v47, %v236_v46  ;;  %v241_v51 = vsel %vm235_vm0, %v230_v44, 0.0 }
  0x93   : > { %v245_v62 = vsel %vm235_vm0, %v232_v52, 0.0 }
  0x94   : > { %v240_v53 = vadd.f32 %v239_v49, %v238_v48  ;;  %v207_v55 = vpop.xlane.xlu0 %206  ;;  %v265_v48 = vld [vmem:[%s874_s2 + $0x38] sm:$0xff]  ;;  %v264_v49 = vld [vmem:[%s874_s2 + $0x30] sm:$0xff] }
  0x95   : > { %v217_v56 = vmul.f32 0.00390625, %v207_v55  ;;  %v210_v58 = vpop.xlane.xlu1 %209 }
  0x96   : > { %v242_v59 = vadd.f32 %v241_v51, %v240_v53  ;;  %v218_v60 = vmul.f32 0.00390625, %v210_v58 }
  0x97   : > { %v233_v63 = vmul.f32 %v225_v54, %v217_v56 }
  0x98   : > { %v244_v3 = vadd.f32 %v243_v61, %v242_v59  ;;  %v234_v7 = vmul.f32 %v226_v57, %v218_v60 }
  0x99   : > { %v247_v8 = vsel %vm235_vm0, %v233_v63, 0.0 }
  0x9a   : > { %v246_v15 = vadd.f32 %v245_v62, %v244_v3  ;;  %v249_v16 = vsel %vm235_vm0, %v234_v7, 0.0 }
  0x9c   : > { %v248_v17 = vadd.f32 %v247_v8, %v246_v15 }
  0x9e   : > { %v250_v22 = vadd.f32 %v249_v16, %v248_v17 }
  0xa0   : > { %v251_v23 = vrot.slane %v250_v22, 4 }
  0xa2   : > { %v252_v24 = vadd.f32 %v251_v23, %v250_v22 }
  0xa4   : > { %v253_v25 = vrot.slane %v252_v24, 2 }
  0xa6   : > { %v254_v26 = vadd.f32 %v253_v25, %v252_v24 }
  0xa8   : > { %v255_v27 = vrot.slane %v254_v26, 1 }
  0xaa   : > { %v256_v28 = vadd.f32 %v255_v27, %v254_v26 }
  0xac   : > { %v257_v32 = vmax.f32 %v256_v28, 0.0 }
  0xae   : > { %v268_v33 = vmul.f32 %v260_v29, %v257_v32  ;;  %v267_v34 = vmul.f32 %v259_v30, %v257_v32  ;;  %v266_v35 = vmul.f32 %v258_v31, %v257_v32  ;;  %v271_v42 = vmul.f32 %v263_v39, %v257_v32 }
  0xaf   : > { %v270_v43 = vmul.f32 %v262_v40, %v257_v32  ;;  %v269_v44 = vmul.f32 %v261_v41, %v257_v32  ;;  %v273_v50 = vmul.f32 %v265_v48, %v257_v32  ;;  %v272_v51 = vmul.f32 %v264_v49, %v257_v32 }
  0xb0   : > { %v280_v36 = vsel %vm235_vm0, %v268_v33, 0.0  ;;  %v277_v37 = vsel %vm235_vm0, %v267_v34, 0.0  ;;  %v274_v38 = vsel %vm235_vm0, %v266_v35, 0.0  ;;  %v289_v45 = vsel %vm235_vm0, %v271_v42, 0.0 }
  0xb1   : > { %281 = vadd.xlane.f32.xlu1 %v280_v36  ;;  %278 = vadd.xlane.f32.xlu0 %v277_v37  ;;  %v286_v46 = vsel %vm235_vm0, %v270_v43, 0.0  ;;  %v283_v47 = vsel %vm235_vm0, %v269_v44, 0.0  ;;  %v295_v52 = vsel %vm235_vm0, %v273_v50, 0.0  ;;  %v292_v53 = vsel %vm235_vm0, %v272_v51, 0.0 }
  0xb2   : > { %275 = vadd.xlane.f32.xlu2 %v274_v38 }
  0xb9   : > { %290 = vadd.xlane.f32.xlu1 %v289_v45  ;;  %287 = vadd.xlane.f32.xlu0 %v286_v46 }
  0xba   : > { %284 = vadd.xlane.f32.xlu2 %v283_v47 }
  0xc1   : > { %296 = vadd.xlane.f32.xlu0 %v295_v52 }
  0xc2   : > { %293 = vadd.xlane.f32.xlu2 %v292_v53 }
 0x124   : > { %v282_v54 = vpop.xlane.xlu1 %281  ;;  %v279_v55 = vpop.xlane.xlu0 %278 }
 0x125   : > { %v548_v56 = vmul.f32 -1.442695, %v282_v54  ;;  %v547_v57 = vmul.f32 -1.442695, %v279_v55  ;;  %v276_v58 = vpop.xlane.xlu2 %275 }
 0x126   : > { %v546_v59 = vmul.f32 -1.442695, %v276_v58 }
 0x127   : > { %566 = vpow2.f32 %v548_v56 }
 0x128   : > { %568 = vpow2.f32 %v547_v57 }
 0x129   : > { %570 = vpow2.f32 %v546_v59 }
 0x12c   : > { %v291_v60 = vpop.xlane.xlu1 %290  ;;  %v288_v61 = vpop.xlane.xlu0 %287 }
 0x12d   : > { %v567_v62 = vpop.eup %566  ;;  %v551_v63 = vmul.f32 -1.442695, %v291_v60  ;;  %v285_v3 = vpop.xlane.xlu2 %284  ;;  %v550_v15 = vmul.f32 -1.442695, %v288_v61 }
 0x12e   : > { %v569_v7 = vpop.eup %568  ;;  %v324_v8 = vadd.f32 1.0, %v567_v62  ;;  %v549_v22 = vmul.f32 -1.442695, %v285_v3 }
 0x12f   : > { %v571_v16 = vpop.eup %570  ;;  %v323_v17 = vadd.f32 1.0, %v569_v7  ;;  %572 = vpow2.f32 %v551_v63 }
 0x130   : > { %574 = vrcp.f32 %v324_v8  ;;  %v754_v23 = vadd.f32 1.0, %v571_v16  ;;  %v369_v24 = vand.u32 2147483647, %v324_v8  ;;  %v371_v25 = vand.u32 2147483648, %v324_v8 }
 0x131   : > { %576 = vrcp.f32 %v323_v17  ;;  %v354_v28 = vand.u32 2147483647, %v323_v17  ;;  %v356_v31 = vand.u32 2147483648, %v323_v17  ;;  %vm365_vm1 = vweird.f32 %v324_v8 }
 0x132   : > { %578 = vpow2.f32 %v550_v15  ;;  %vm350_vm2 = vweird.f32 %v323_v17  ;;  %vm759_vm3 = vcmp.eq.f32.partialorder %v369_v24, 8.507059e+37  ;;  %v372_v39 = vor.u32 1.1754944e-38, %v371_v25 }
 0x133   : > { %580 = vpow2.f32 %v549_v22  ;;  %vm764_vm4 = vcmp.eq.f32.partialorder %v354_v28, 8.507059e+37  ;;  %v339_v44 = vand.u32 2147483647, %v754_v23  ;;  %v357_v48 = vor.u32 1.1754944e-38, %v356_v31 }
 0x134   : > { %582 = vrcp.f32 %v754_v23  ;;  %v297_v26 = vpop.xlane.xlu0 %296  ;;  %v341_v53 = vand.u32 2147483648, %v754_v23  ;;  %vm335_vm7 = vweird.f32 %v754_v23 }
 0x135   : > { %v573_v27 = vpop.eup %572  ;;  %v294_v29 = vpop.xlane.xlu2 %293  ;;  %v553_v33 = vmul.f32 -1.442695, %v297_v26  ;;  %vm777_vm8 = vcmp.eq.f32.partialorder %v339_v44, 8.507059e+37 }
 0x136   : > { %v575_v30 = vpop.eup %574  ;;  %v757_v32 = vadd.f32 1.0, %v573_v27  ;;  %v552_v36 = vmul.f32 -1.442695, %v294_v29  ;;  %v342_v15 = vor.u32 1.1754944e-38, %v341_v53 }
 0x137   : > { %v577_v34 = vpop.eup %576  ;;  %v361_v35 = vmul.f32 %v575_v30, %v324_v8  ;;  %vm366_vm5 = vweird.f32 %v575_v30 }
 0x138   : > { %v579_v37 = vpop.eup %578  ;;  %v346_v40 = vmul.f32 %v577_v34, %v323_v17  ;;  %584 = vrcp.f32 %v757_v32  ;;  %vm351_vm6 = vweird.f32 %v577_v34  ;;  %vm367_vm9 = vmor %vm365_vm1, %vm366_vm5  ;;  %v414_v59 = vand.u32 2147483647, %v757_v32 }
 0x139   : > { %v581_v41 = vpop.eup %580  ;;  %v362_v42 = vsub.f32 1.0, %v361_v35  ;;  %v769_v45 = vadd.f32 1.0, %v579_v37  ;;  %586 = vpow2.f32 %v553_v33  ;;  %v416_v60 = vand.u32 2147483648, %v757_v32  ;;  %vm352_vm10 = vmor %vm350_vm2, %vm351_vm6 }
 0x13a   : > { %v583_v46 = vpop.eup %582  ;;  %v347_v47 = vsub.f32 1.0, %v346_v40  ;;  %v771_v49 = vadd.f32 1.0, %v581_v41  ;;  %588 = vpow2.f32 %v552_v36  ;;  %vm410_vm12 = vweird.f32 %v757_v32 }
 0x13b   : > { %v363_v50 = vmul.f32 %v575_v30, %v362_v42  ;;  %v331_v51 = vmul.f32 %v583_v46, %v754_v23  ;;  %590 = vrcp.f32 %v769_v45  ;;  %vm336_vm11 = vweird.f32 %v583_v46 }
 0x13c   : > { %v348_v52 = vmul.f32 %v577_v34, %v347_v47  ;;  %592 = vrcp.f32 %v771_v49  ;;  %vm337_vm13 = vmor %vm335_vm7, %vm336_vm11  ;;  %vm806_vm14 = vcmp.eq.f32.partialorder %v414_v59, 8.507059e+37  ;;  %vm395_vm0 = vweird.f32 %v769_v45 }
 0x13d   : > { %v364_v54 = vadd.f32 %v575_v30, %v363_v50  ;;  %v332_v55 = vsub.f32 1.0, %v331_v51  ;;  %v401_v40 = vand.u32 2147483648, %v769_v45  ;;  %v384_v43 = vand.u32 2147483647, %v771_v49 }
 0x13e   : > { %v585_v57 = vpop.eup %584  ;;  %v349_v58 = vadd.f32 %v577_v34, %v348_v52  ;;  %v386_v44 = vand.u32 2147483648, %v771_v49  ;;  %vm380_vm6 = vweird.f32 %v771_v49 }
 0x13f   : > { %v368_v61 = vsel %vm367_vm9, %v575_v30, %v364_v54  ;;  %v333_v62 = vmul.f32 %v583_v46, %v332_v55  ;;  %v406_v63 = vmul.f32 %v585_v57, %v757_v32  ;;  %v587_v3 = vpop.eup %586  ;;  %vm411_vm15 = vweird.f32 %v585_v57 }
 0x140   : > { %v373_v7 = vsel %vm759_vm3, %v372_v39, %v368_v61  ;;  %v353_v8 = vsel %vm352_vm10, %v577_v34, %v349_v58  ;;  %v589_v16 = vpop.eup %588  ;;  %v417_v30 = vor.u32 1.1754944e-38, %v416_v60  ;;  %v815_v33 = vadd.f32 1.0, %v587_v3  ;;  %vm412_vm1 = vmor %vm410_vm12, %vm411_vm15 }
 0x141   : > { %v454_v17 = vmul.f32 %v373_v7, %v646_v2  ;;  %v455_v22 = vmul.f32 %v373_v7, %v650_v4  ;;  %v358_v24 = vsel %vm764_vm4, %v357_v48, %v353_v8  ;;  %v334_v25 = vadd.f32 %v583_v46, %v333_v62  ;;  %v591_v26 = vpop.eup %590 }
 0x142   : > { %v452_v27 = vmul.f32 %v358_v24, %v660_v9  ;;  %v453_v28 = vmul.f32 %v358_v24, %v662_v10  ;;  %v407_v29 = vsub.f32 1.0, %v406_v63  ;;  %v391_v31 = vmul.f32 %v591_v26, %v769_v45  ;;  %v593_v9 = vpop.eup %592 }
 0x143   : > { %470 = vst [vmem:[%s792_s28 + $0x20] sm:$0xff] %v454_v17  ;;  %v338_v4 = vsel %vm337_vm13, %v583_v46, %v334_v25  ;;  %v817_v34 = vadd.f32 1.0, %v589_v16  ;;  %v376_v38 = vmul.f32 %v593_v9, %v771_v49  ;;  %594 = vrcp.f32 %v815_v33 }
 0x144   : > { %471 = vst [vmem:[%s792_s28 + $0x28] sm:$0xff] %v455_v22  ;;  %v343_v10 = vsel %vm777_vm8, %v342_v15, %v338_v4  ;;  %v408_v23 = vmul.f32 %v585_v57, %v407_v29  ;;  %v392_v37 = vsub.f32 1.0, %v391_v31  ;;  %vm396_vm2 = vweird.f32 %v591_v26 }
 0x145   : > { %468 = vst [vmem:[%s792_s28 + $0x10] sm:$0xff] %v452_v27  ;;  %v450_v35 = vmul.f32 %v343_v10, %v642_v0  ;;  %v451_v36 = vmul.f32 %v343_v10, %v644_v1  ;;  %v399_v0 = vand.u32 2147483647, %v769_v45  ;;  %v377_v1 = vsub.f32 1.0, %v376_v38  ;;  %vm397_vm4 = vmor %vm395_vm0, %vm396_vm2 }
 0x146   : > { %469 = vst [vmem:[%s792_s28 + $0x18] sm:$0xff] %v453_v28  ;;  %v409_v39 = vadd.f32 %v585_v57, %v408_v23  ;;  %v393_v41 = vmul.f32 %v591_v26, %v392_v37  ;;  %596 = vrcp.f32 %v817_v34  ;;  %vm381_vm3 = vweird.f32 %v593_v9 }
 0x147   : > { %466 = vst [vmem:[%s792_s28] sm:$0xff] %v450_v35  ;;  %v378_v32 = vmul.f32 %v593_v9, %v377_v1  ;;  %v402_v51 = vor.u32 1.1754944e-38, %v401_v40  ;;  %vm400_vm5 = vcmp.eq.f32.partialorder %v399_v0, 8.507059e+37  ;;  %vm382_vm7 = vmor %vm380_vm6, %vm381_vm3  ;;  %vm385_vm8 = vcmp.eq.f32.partialorder %v384_v43, 8.507059e+37 }
 0x148   : > { %467 = vst [vmem:[%s792_s28 + $0x8] sm:$0xff] %v451_v36  ;;  %v413_v42 = vsel %vm412_vm1, %v585_v57, %v409_v39  ;;  %v394_v47 = vadd.f32 %v591_v26, %v393_v41  ;;  %v446_v63 = vand.u32 2147483648, %v815_v33  ;;  %vm440_vm10 = vweird.f32 %v815_v33 }
 0x149   : > { %v418_v46 = vsel %vm806_vm14, %v417_v30, %v413_v42  ;;  %v379_v53 = vadd.f32 %v593_v9, %v378_v32  ;;  %v595_v54 = vpop.eup %594  ;;  %v431_v7 = vand.u32 2147483648, %v817_v34  ;;  %vm425_vm14 = vweird.f32 %v817_v34 }
 0x14a   : > { %v460_v48 = vmul.f32 %v418_v46, %v668_v13  ;;  %v461_v50 = vmul.f32 %v418_v46, %v670_v14  ;;  %v398_v52 = vsel %vm397_vm4, %v591_v26, %v394_v47  ;;  %v387_v13 = vor.u32 1.1754944e-38, %v386_v44 }
 0x14b   : > { %v403_v55 = vsel %vm400_vm5, %v402_v51, %v398_v52  ;;  %v383_v56 = vsel %vm382_vm7, %v593_v9, %v379_v53  ;;  %v436_v57 = vmul.f32 %v595_v54, %v815_v33  ;;  %vm441_vm9 = vweird.f32 %v595_v54 }
 0x14c   : > { %476 = vst [vmem:[%s792_s28 + $0x50] sm:$0xff] %v460_v48  ;;  %v458_v14 = vmul.f32 %v403_v55, %v652_v5  ;;  %v459_v45 = vmul.f32 %v403_v55, %v654_v6  ;;  %v597_v58 = vpop.eup %596  ;;  %v388_v59 = vsel %vm385_vm8, %v387_v13, %v383_v56  ;;  %v444_v6 = vand.u32 2147483647, %v815_v33  ;;  %vm442_vm12 = vmor %vm440_vm10, %vm441_vm9 }
 0x14d   : > { %477 = vst [vmem:[%s792_s28 + $0x58] sm:$0xff] %v461_v50  ;;  %v456_v49 = vmul.f32 %v388_v59, %v664_v11  ;;  %v457_v60 = vmul.f32 %v388_v59, %v666_v12  ;;  %v437_v61 = vsub.f32 1.0, %v436_v57  ;;  %v421_v62 = vmul.f32 %v597_v58, %v817_v34 }
 0x14e   : > { %474 = vst [vmem:[%s792_s28 + $0x40] sm:$0xff] %v458_v14  ;;  %vm426_vm11 = vweird.f32 %v597_v58  ;;  %v429_v12 = vand.u32 2147483647, %v817_v34  ;;  %v447_v15 = vor.u32 1.1754944e-38, %v446_v63  ;;  %vm445_vm13 = vcmp.eq.f32.partialorder %v444_v6, 8.507059e+37 }
 0x14f   : > { %475 = vst [vmem:[%s792_s28 + $0x48] sm:$0xff] %v459_v45  ;;  %v438_v5 = vmul.f32 %v595_v54, %v437_v61  ;;  %v422_v3 = vsub.f32 1.0, %v421_v62  ;;  %vm427_vm15 = vmor %vm425_vm14, %vm426_vm11  ;;  %v432_v24 = vor.u32 1.1754944e-38, %v431_v7 }
 0x150   : > { %472 = vst [vmem:[%s792_s28 + $0x30] sm:$0xff] %v456_v49  ;;  %vm430_vm0 = vcmp.eq.f32.partialorder %v429_v12, 8.507059e+37 }
 0x151   : > { %473 = vst [vmem:[%s792_s28 + $0x38] sm:$0xff] %v457_v60  ;;  %v439_v11 = vadd.f32 %v595_v54, %v438_v5  ;;  %v423_v8 = vmul.f32 %v597_v58, %v422_v3 }
 0x153   : > { %v443_v16 = vsel %vm442_vm12, %v595_v54, %v439_v11  ;;  %v424_v17 = vadd.f32 %v597_v58, %v423_v8 }
 0x154   : > { %v448_v22 = vsel %vm445_vm13, %v447_v15, %v443_v16 }
 0x155   : > { %v464_v25 = vmul.f32 %v448_v22, %v682_v20  ;;  %v465_v26 = vmul.f32 %v448_v22, %v684_v21  ;;  %v428_v27 = vsel %vm427_vm15, %v597_v58, %v424_v17 }
 0x156   : > { %v433_v28 = vsel %vm430_vm0, %v432_v24, %v428_v27 }
 0x157   : > { %480 = vst [vmem:[%s792_s28 + $0x70] sm:$0xff] %v464_v25  ;;  %v462_v29 = vmul.f32 %v433_v28, %v678_v18  ;;  %v463_v2 = vmul.f32 %v433_v28, %v680_v19 }
 0x158   : > { %481 = vst [vmem:[%s792_s28 + $0x78] sm:$0xff] %v465_v26 }
 0x159   : > { %478 = vst [vmem:[%s792_s28 + $0x60] sm:$0xff] %v462_v29 }
 0x15a   : > { %479 = vst [vmem:[%s792_s28 + $0x68] sm:$0xff] %v463_v2 }
 0x15b PF: > { %s13_s12 = sadd.s32 1, %s604_s12  }
 0x15c   : > { %p10_p4 = scmp.ge.s32.totalorder %s13_s12, 4  }
 0x15e   :  { %12 = sbr.rel (!%p10_p4) target bundleno = 1 (0x1), region = 62 }

</bundles_post_ra>
